<compile_context>
chip_gen: v6e
topology: v6e:2x2x1
jax: 0.10.0
libtpu: 0.0.40
codegen_flags: <defaults>
</compile_context>

<pallas_src>
import jax
import jax.numpy as jnp
import numpy as np
from jax.experimental import pallas as pl
from jax.experimental.pallas import tpu as pltpu

K = 4            # healpix pooling window (fixed by the module)
_LANE = 128      # TPU lane width
_R_CAP = 256     # rows (batch*feature) per tile cap   (multiple of 32)
_PP_CAP = 1024   # pooled pixels per tile cap          (multiple of 128)
_MiB = 1024 * 1024


# ------------------------------------------------------------------ kernels --
def _avg_pool_kernel(x_ref, o_ref):
    # x_ref: (K, tR, tPp) -> o_ref: (tR, tPp).  Accumulate in f32, cast back.
    x = x_ref[...].astype(jnp.float32)
    o_ref[...] = ((x[0] + x[1] + x[2] + x[3]) * 0.25).astype(o_ref.dtype)


def _max_pool_kernel(x_ref, o_ref, idx_ref):
    # x_ref: (K, tR, tPp) -> o_ref: (tR, tPp) max values,
    # idx_ref: (tR, tPp) absolute indices into the original pixel axis
    # (PyTorch max_pool1d semantics, first-max tie break), including the
    # per-tile pixel offset so tiling does not change index semantics.
    x0, x1, x2, x3 = x_ref[0], x_ref[1], x_ref[2], x_ref[3]
    m01 = jnp.maximum(x0, x1)
    i01 = jnp.where(x1 > x0, 1, 0)            # strict '>' -> first-max tie break
    m23 = jnp.maximum(x2, x3)
    i23 = jnp.where(x3 > x2, 3, 2)
    k = jnp.where(m23 > m01, i23, i01).astype(jnp.int32)
    tPp = o_ref.shape[1]
    col = (pl.program_id(1) * tPp
           + jax.lax.broadcasted_iota(jnp.int32, o_ref.shape, 1))
    o_ref[...] = jnp.maximum(m01, m23)
    idx_ref[...] = col * K + k


def _avg_unpool_kernel(x_ref, o_ref):
    # x_ref: (tR, tPp) -> o_ref: (K, tR, tPp)   (nearest-neighbour repeat x4)
    o_ref[...] = jnp.broadcast_to(x_ref[...][None], o_ref.shape)


def _max_unpool_kernel(x_ref, idx_ref, o_ref):
    # x_ref, idx_ref: (tR, tPp) -> o_ref: (K, tR, tPp); scatter x into slot
    # (idx - 4*global_pixel) within each window of 4, zeros elsewhere.
    # Indices produced by the matching max-pool always fall inside their window.
    x = x_ref[...]
    tPp = x.shape[1]
    col = (pl.program_id(1) * tPp
           + jax.lax.broadcasted_iota(jnp.int32, x.shape, 1))
    k = idx_ref[...] - col * K                 # window-local index in [0, K)
    zero = jnp.zeros_like(x)
    for kk in range(K):
        o_ref[kk] = jnp.where(k == kk, x, zero)


# -------------------------------------------------------------- tile sizing --
def _cdiv(a, b):
    return -(-a // b)


def _round_up(n, m):
    return _cdiv(n, m) * m


def _sublane_align(dtype):
    return {4: 8, 2: 16, 1: 32}.get(jnp.dtype(dtype).itemsize, 8)


def _pick_tiles(R, Pp, dtype):
    """Fixed lane-dense tile caps + cdiv grid (Pallas handles ragged edge
    blocks).  Never collapses to tiny tiles and never exceeds the VMEM budget,
    regardless of how awkward R / Pp are (review item 3)."""
    ra = _sublane_align(dtype)
    tR = R if R <= _R_CAP else _R_CAP          # cap is a multiple of `ra`
    tPp = Pp if Pp <= _PP_CAP else _PP_CAP     # cap is a multiple of 128
    # Guarantee >= 2 blocks along a parallel axis when possible so both
    # TensorCores of a v7x megacore get work (review item 6).
    if _cdiv(R, tR) * _cdiv(Pp, tPp) == 1:
        if R > ra:
            tR = _round_up(_cdiv(R, 2), ra)
        elif Pp > _LANE:
            tPp = _round_up(_cdiv(Pp, 2), _LANE)
    return tR, tPp


def _compiler_params(block_bytes, fuse_inputs=None):
    # Explicit scoped-VMEM limit sized from the double-buffered working set
    # (+ headroom) -- keeps big tiles legal on v5e (16 MiB default) and well
    # inside v7x's 64 MiB physical VMEM.
    vmem = int(min(max(32 * _MiB, 2 * block_bytes + 8 * _MiB), 64 * _MiB))
    return pltpu.CompilerParams(
        dimension_semantics=("parallel", "parallel"),
        vmem_limit_bytes=vmem,
        allow_input_fusion=fuse_inputs,
    )


# ----------------------------------------------------------------- wrappers --
def healpix_avg_pool(x):
    B, C, P = x.shape
    Pp, R = P // K, B * C
    esz = jnp.dtype(x.dtype).itemsize
    # TODO(synk): review item 1(b) -- consume the raw interleaved (R, P) layout
    # and de-interleave in-kernel to drop this materializing XLA transpose
    # (one extra HBM pass over the largest tensor).  allow_input_fusion below
    # is the advisory route (a); it is harmless if XLA declines to fuse.
    xg = x.reshape(R, Pp, K).transpose(2, 0, 1)              # (K, R, Pp)
    tR, tPp = _pick_tiles(R, Pp, x.dtype)
    block_bytes = (K + 1) * tR * tPp * esz
    out = pl.pallas_call(
        _avg_pool_kernel,
        grid=(_cdiv(R, tR), _cdiv(Pp, tPp)),
        in_specs=[pl.BlockSpec((K, tR, tPp), lambda i, j: (0, i, j))],
        out_specs=pl.BlockSpec((tR, tPp), lambda i, j: (i, j)),
        out_shape=jax.ShapeDtypeStruct((R, Pp), x.dtype),
        compiler_params=_compiler_params(block_bytes, fuse_inputs=[True]),
        cost_estimate=pl.CostEstimate(
            flops=int(4 * R * Pp), transcendentals=0,
            bytes_accessed=int(R * P * esz + R * Pp * esz)),
    )(xg)
    return out.reshape(B, C, Pp), None


def healpix_max_pool(x):
    B, C, P = x.shape
    Pp, R = P // K, B * C
    esz = jnp.dtype(x.dtype).itemsize
    # TODO(synk): same de-interleave fusion opportunity as healpix_avg_pool.
    xg = x.reshape(R, Pp, K).transpose(2, 0, 1)              # (K, R, Pp)
    tR, tPp = _pick_tiles(R, Pp, x.dtype)
    block_bytes = (K + 1) * tR * tPp * esz + tR * tPp * 4
    vals, idx = pl.pallas_call(
        _max_pool_kernel,
        grid=(_cdiv(R, tR), _cdiv(Pp, tPp)),
        in_specs=[pl.BlockSpec((K, tR, tPp), lambda i, j: (0, i, j))],
        out_specs=(pl.BlockSpec((tR, tPp), lambda i, j: (i, j)),
                   pl.BlockSpec((tR, tPp), lambda i, j: (i, j))),
        out_shape=(jax.ShapeDtypeStruct((R, Pp), x.dtype),
                   jax.ShapeDtypeStruct((R, Pp), jnp.int32)),
        compiler_params=_compiler_params(block_bytes, fuse_inputs=[True]),
        cost_estimate=pl.CostEstimate(
            flops=int(8 * R * Pp), transcendentals=0,
            bytes_accessed=int(R * P * esz + R * Pp * esz + R * Pp * 4)),
    )(xg)
    return vals.reshape(B, C, Pp), idx.reshape(B, C, Pp)


def healpix_avg_unpool(x):
    B, C, Pp = x.shape
    R = B * C
    esz = jnp.dtype(x.dtype).itemsize
    tR, tPp = _pick_tiles(R, Pp, x.dtype)
    block_bytes = (K + 1) * tR * tPp * esz
    out = pl.pallas_call(
        _avg_unpool_kernel,
        grid=(_cdiv(R, tR), _cdiv(Pp, tPp)),
        in_specs=[pl.BlockSpec((tR, tPp), lambda i, j: (i, j))],
        out_specs=pl.BlockSpec((K, tR, tPp), lambda i, j: (0, i, j)),
        out_shape=jax.ShapeDtypeStruct((K, R, Pp), x.dtype),
        compiler_params=_compiler_params(block_bytes),
        cost_estimate=pl.CostEstimate(
            flops=int(K * R * Pp), transcendentals=0,
            bytes_accessed=int((K + 1) * R * Pp * esz)),
    )(x.reshape(R, Pp))
    # TODO(synk): review item 2 -- emit the interleaved (tR, K*tPp) layout from
    # the kernel directly to avoid this extra XLA pass over the largest tensor.
    return out.transpose(1, 2, 0).reshape(B, C, Pp * K), None


def healpix_max_unpool(x, indices):
    B, C, Pp = x.shape
    R = B * C
    esz = jnp.dtype(x.dtype).itemsize
    tR, tPp = _pick_tiles(R, Pp, x.dtype)
    block_bytes = (K + 1) * tR * tPp * esz + tR * tPp * 4
    out = pl.pallas_call(
        _max_unpool_kernel,
        grid=(_cdiv(R, tR), _cdiv(Pp, tPp)),
        in_specs=[pl.BlockSpec((tR, tPp), lambda i, j: (i, j)),
                  pl.BlockSpec((tR, tPp), lambda i, j: (i, j))],
        out_specs=pl.BlockSpec((K, tR, tPp), lambda i, j: (0, i, j)),
        out_shape=jax.ShapeDtypeStruct((K, R, Pp), x.dtype),
        compiler_params=_compiler_params(block_bytes),
        cost_estimate=pl.CostEstimate(
            flops=int(2 * K * R * Pp), transcendentals=0,
            bytes_accessed=int(R * Pp * (esz + 4) + K * R * Pp * esz)),
    )(x.reshape(R, Pp), indices.reshape(R, Pp).astype(jnp.int32))
    # TODO(synk): same as avg_unpool -- emit the interleaved layout in-kernel.
    return out.transpose(1, 2, 0).reshape(B, C, Pp * K), None


class HealpixPooling:
    """JAX/Pallas port of spherical_inns HealpixPooling (no learnable params)."""

    def __init__(self, mode="average"):
        self.mode = mode
        # TODO(synk): original module leaves pooling_layer unset for mode='average'
        # (latent bug upstream); only 'max'/'mean'/'un_max'/'un_mean' are usable.

    def __call__(self, x, index=None):
        if self.mode == "max":
            return healpix_max_pool(x)
        if self.mode == "mean":
            return healpix_avg_pool(x)
        if self.mode == "un_max":
            return healpix_max_unpool(x, index)
        if self.mode == "un_mean":
            return healpix_avg_unpool(x)
        raise ValueError(f"unsupported mode: {self.mode!r}")


# -------------------------------------------------------------------- main ---
def _check_case(key, B, C, P):
    x = jax.random.normal(key, (B, C, P), dtype=jnp.float32)

    pooled_mean, _ = HealpixPooling("mean")(x)
    pooled_max, idx = HealpixPooling("max")(x)
    unpooled_mean, _ = HealpixPooling("un_mean")(pooled_mean)
    unpooled_max, _ = HealpixPooling("un_max")(pooled_max, idx)
    jax.block_until_ready(
        (pooled_mean, pooled_max, idx, unpooled_mean, unpooled_max))

    # Reference checks (F.avg_pool1d / F.max_pool1d / nearest / max_unpool1d).
    xn = np.asarray(x).reshape(B, C, P // K, K)
    np.testing.assert_allclose(np.asarray(pooled_mean), xn.mean(-1),
                               rtol=1e-6, atol=1e-6)
    np.testing.assert_allclose(np.asarray(pooled_max), xn.max(-1), rtol=0, atol=0)
    ref_idx = K * np.arange(P // K)[None, None, :] + xn.argmax(-1)
    np.testing.assert_array_equal(np.asarray(idx), ref_idx)
    np.testing.assert_allclose(
        np.asarray(unpooled_mean), np.repeat(np.asarray(pooled_mean), K, axis=-1),
        rtol=0, atol=0)
    ref_unmax = np.zeros((B, C, P), np.float32)
    np.put_along_axis(ref_unmax, ref_idx, np.asarray(pooled_max), axis=-1)
    np.testing.assert_allclose(np.asarray(unpooled_max), ref_unmax, rtol=0, atol=0)


if __name__ == "__main__":
    key = jax.random.PRNGKey(0)
    k1, k2, k3, k4 = jax.random.split(key, 4)
    # Small demo (192 = 12*nside^2, nside=4): single block, no megacore split.
    _check_case(k1, B=2, C=4, P=192)
    # Medium (P=3072, nside=16): exercises the megacore row split (grid=(2,1)).
    _check_case(k2, B=2, C=8, P=3072)
    # Ragged rows (R=15 not a multiple of 8): exercises cdiv grid + masked
    # edge blocks from the new fixed-tile tiling.
    _check_case(k3, B=3, C=5, P=768)
    # Multi-block lane axis (Pp=3072 > tile cap) + sub-8-row blocks (R=6):
    # exercises the per-tile absolute-index offsets along the pixel grid axis.
    _check_case(k4, B=2, C=3, P=12288)

    print("KERNEL_OK")
</pallas_src>

<mosaic_0001>
module attributes {stable_mosaic.version = 11 : i64} {
  func.func @_avg_pool_kernel(%arg0: i32, %arg1: i32, %arg2: memref<4x8x48xf32, #tpu.memory_space<vmem>>, %arg3: memref<8x48xf32, #tpu.memory_space<vmem>>) attributes {dimension_semantics = [#tpu.dimension_semantics<parallel>, #tpu.dimension_semantics<parallel>], iteration_bounds = array<i64: 1, 1>, scalar_prefetch = 0 : i64, scratch_operands = 0 : i64, tpu.core_type = #tpu.core_type<tc>, window_params = [{transform_indices = @transform_0, window_bounds = array<i64: 4, 8, 48>}, {transform_indices = @transform_1, window_bounds = array<i64: 8, 48>}]} {
    %c0 = arith.constant 0 : index
    %c0_0 = arith.constant 0 : index
    %c0_1 = arith.constant 0 : index
    %0 = vector.load %arg2[%c0, %c0_0, %c0_1] : memref<4x8x48xf32, #tpu.memory_space<vmem>>, vector<4x8x48xf32>
    %1 = vector.extract_strided_slice %0 {offsets = [0, 0, 0], sizes = [1, 8, 48], strides = [1, 1, 1]} : vector<4x8x48xf32> to vector<1x8x48xf32>
    %2 = vector.shape_cast %1 : vector<1x8x48xf32> to vector<8x48xf32>
    %3 = vector.extract_strided_slice %0 {offsets = [1, 0, 0], sizes = [1, 8, 48], strides = [1, 1, 1]} : vector<4x8x48xf32> to vector<1x8x48xf32>
    %4 = vector.shape_cast %3 : vector<1x8x48xf32> to vector<8x48xf32>
    %5 = arith.addf %2, %4 : vector<8x48xf32>
    %6 = vector.extract_strided_slice %0 {offsets = [2, 0, 0], sizes = [1, 8, 48], strides = [1, 1, 1]} : vector<4x8x48xf32> to vector<1x8x48xf32>
    %7 = vector.shape_cast %6 : vector<1x8x48xf32> to vector<8x48xf32>
    %8 = arith.addf %5, %7 : vector<8x48xf32>
    %9 = vector.extract_strided_slice %0 {offsets = [3, 0, 0], sizes = [1, 8, 48], strides = [1, 1, 1]} : vector<4x8x48xf32> to vector<1x8x48xf32>
    %10 = vector.shape_cast %9 : vector<1x8x48xf32> to vector<8x48xf32>
    %11 = arith.addf %8, %10 : vector<8x48xf32>
    %cst = arith.constant 2.500000e-01 : f32
    %12 = vector.broadcast %cst : f32 to vector<8x48xf32>
    %13 = arith.mulf %11, %12 : vector<8x48xf32>
    %c0_2 = arith.constant 0 : index
    %c0_3 = arith.constant 0 : index
    %14 = vector.load %arg3[%c0_2, %c0_3] : memref<8x48xf32, #tpu.memory_space<vmem>>, vector<8x48xf32>
    tpu.vector_store %arg3[%c0_2, %c0_3], %13 {strides = array<i32>} : memref<8x48xf32, #tpu.memory_space<vmem>>, vector<8x48xf32>,
    return
  }
  func.func @transform_0(%arg0: i32, %arg1: i32) -> (i32, i32, i32) {
    %c0_i32 = arith.constant 0 : i32
    %c0_i32_0 = arith.constant 0 : i32
    return %c0_i32, %arg0, %arg1 : i32, i32, i32
  }
  func.func @transform_1(%arg0: i32, %arg1: i32) -> (i32, i32) {
    %c0_i32 = arith.constant 0 : i32
    return %arg0, %arg1 : i32, i32
  }
}

</mosaic_0001>

<bundles_post_ra>
// kernel: tpu_custom_call.1
= control target key start
LH: loop header
LB: loop body
LE: loop exit
PB: predicated region body
PF: predicated region fallthrough
CT: control target
= control target key end

     0   :  { %6 = vsyncpa [#allocation3], 0  ;;  %s116_s0 = inlined_call_operand.hbm [shape: f32[4,8,48], index: 0, kind: input, shape index: {}]   ;;  %s117_s1 = inlined_call_operand.hbm [shape: f32[8,48], index: 1, kind: output, shape index: {}]  }
   0x1   :  { %7 = vsyncpa [#allocation4], 0  ;;  %s96_s6 = smov [#allocation2]  }
   0x2   :  { %s13_s7 = sshll.u32 %s96_s6, 4  ;;  %s14_s7 = int_to_ptr.vmem [resolvable:$true] %s13_s7 }
   0x3   :  { %s60_s8 = scalar_lea.vmem %s14_s7, 512  ;;  %p65_p1 = scmp.lt.s32.totalorder %s14_s7, %s14_s7 }
   0x4   :  { %p61_p0 = scmp.ne.s32.totalorder %s14_s7, %s60_s8  ;;  %p66_p2 = scmp.lt.s32.totalorder %s60_s8, %s60_s8 }
   0x6   :  { %p67_p3 = por %p66_p2, %p65_p1 }
   0x8   :  { %p68_p4 = pnand %p67_p3, %p61_p0 }
   0xa   :  { %71 = shalt.err (!%p68_p4)
}
   0xb   :  { %s97_s9 = smov 128   ;;  %s98_s10 = smov 8  }
   0xc   :  { %19 = dma.hbm_to_vmem [thread:$0]  %s116_s0, 512, %s14_s7, [#allocation3], %s97_s9, %s97_s9, %s98_s10  }
   0xd   :  { %92 = dma.done.wait [#allocation3], 512  }
   0xe   :  { %93 = vsyncadd [#allocation3], 4294966784  ;;  %v23_v0 = vld [vmem:[#allocation2] sm:$0xff]  ;;  %v24_v1 = vld [vmem:[#allocation2 + $0x8] sm:$0xff]  ;;  %s99_s13 = smov [#allocation5]   ;;  %vm31_vm0 = vcmask 392192  }
   0xf   :  { %v25_v2 = vld [vmem:[#allocation2 + $0x10] sm:$0xff]  ;;  %v27_v3 = vadd.f32 %v24_v1, %v23_v0  ;;  %v26_v4 = vld [vmem:[#allocation2 + $0x18] sm:$0xff]  ;;  %s39_s14 = sshll.u32 %s99_s13, 4  ;;  %s40_s14 = int_to_ptr.vmem [resolvable:$true] %s39_s14 }
  0x10   :  { %s72_s15 = scalar_lea.vmem %s40_s14, 128  ;;  %p77_p6 = scmp.lt.s32.totalorder %s40_s14, %s40_s14 }
  0x11   :  { %v28_v5 = vadd.f32 %v27_v3, %v25_v2  ;;  %p73_p5 = scmp.ne.s32.totalorder %s40_s14, %s72_s15  ;;  %p78_p7 = scmp.lt.s32.totalorder %s72_s15, %s72_s15 }
  0x13   :  { %v29_v6 = vadd.f32 %v28_v5, %v26_v4  ;;  %p79_p8 = por %p78_p7, %p77_p6 }
  0x15   :  { %v30_v7 = vmul.f32 0.25, %v29_v6  ;;  %p80_p9 = pnand %p79_p8, %p73_p5 }
  0x17   :  { %32 = vst.msk [vmem:[#allocation5] sm:$0xff] %vm31_vm0, %v30_v7 }
  0x18   :  { %83 = shalt.err (!%p80_p9)
}
  0x19   :  { %42 = dma.vmem_to_hbm [thread:$0]  %s40_s14, 128, %s117_s1, [#allocation4]  }
  0x1a   :  { %94 = dma.done.wait [#allocation4], 128  }
  0x1b   :  { %95 = vsyncadd [#allocation4], 4294967168 }
  0x1c   :  { %46 = vsyncpa [#allocation3], 1 }
  0x1d   :  { %47 = vsyncpa [#allocation4], 1 }

</bundles_post_ra>
